<compile_context>
chip_gen: v7x
topology: tpu7x:2x2x1
jax: 0.10.0
libtpu: 0.0.40
codegen_flags: <defaults>
</compile_context>

<pallas_src>
import jax
import jax.numpy as jnp
from jax.experimental import pallas as pl
from jax.experimental.pallas import tpu as pltpu


# ----------------------------------------------------------------------------
# Pallas kernel: grid = (B_pad // block_b, N_pad // block_n)
#   axis 0: batch blocks ("parallel"), axis 1: node reduction ("arbitrary").
# ----------------------------------------------------------------------------
def io_b_kernel(
    x_ref,      # (TB, TN, D)   node-feature tile (compute dtype)
    adj_ref,    # (T,  TN)      adjacency, lane-dense, fully resident (f32)
    xi_ref,     # (TB, 1, D)    features of node i (starter / ender)
    hi_ref,     # (TB, 1, H)    hoisted invariant: xi @ W1_i + b1 (f32)
    w1x_ref,    # (D, H)        n2e weight rows acting on current_x
    w2_ref,     # (H, H)        e2e
    b2_ref,     # (1, H)
    w3_ref,     # (H, H)        e2n
    b3_ref,     # (1, H)
    w4_ref,     # (H, H)        n2n
    b4_ref,     # (1, H)
    w5s_ref,    # (D, Dout)     output weight rows acting on starter
    w5h_ref,    # (H, Dout)     output weight rows acting on hidden
    b5_ref,     # (1, Dout)
    out_ref,    # (TB, 1, Dout)
    acc_ref,    # scratch (TB, 1, H) float32 accumulator
):
    n = pl.program_id(1)

    @pl.when(n == 0)
    def _init():
        acc_ref[...] = jnp.zeros_like(acc_ref)

    x = x_ref[...]                          # (TB, TN, D)
    TB, TN, D = x.shape
    H = acc_ref.shape[-1]

    # --- n2e: only the current_x half; the xi half (+ b1) is the hoisted,
    #     grid-invariant hi_ref computed once in the wrapper. -----------------
    hx = jnp.dot(x.reshape(TB * TN, D), w1x_ref[...],
                 preferred_element_type=jnp.float32)              # (TB*TN, H)
    h = jnp.maximum(hx.reshape(TB, TN, H) + hi_ref[...], 0.0)     # bcast (TB,1,H)

    # --- e2e ------------------------------------------------------------------
    h = jnp.dot(h.reshape(TB * TN, H).astype(w2_ref.dtype), w2_ref[...],
                preferred_element_type=jnp.float32) + b2_ref[...]
    h = jnp.maximum(h, 0.0).reshape(TB, TN, H)                    # f32

    # --- adjacency weighting + node reduction on VPU + XLU (these slots have
    #     slack here).  The old batched M=1 dot_general underfilled the MXU
    #     (~1/256 utilization) and reloaded MXU weights per batch element.
    adj = adj_ref[pl.ds(n, 1), :]                                 # (1, TN) f32
    acc_ref[...] += jnp.sum(h * adj[:, :, None], axis=1, keepdims=True)

    # --- epilogue on the last node tile (once per batch block) ----------------
    @pl.when(n == pl.num_programs(1) - 1)
    def _finish():
        s = acc_ref[...][:, 0, :]                                 # (TB, H) f32
        y = jnp.maximum(
            jnp.dot(s.astype(w3_ref.dtype), w3_ref[...],
                    preferred_element_type=jnp.float32) + b3_ref[...], 0.0)
        y = jnp.maximum(
            jnp.dot(y.astype(w4_ref.dtype), w4_ref[...],
                    preferred_element_type=jnp.float32) + b4_ref[...], 0.0)
        xi = xi_ref[...][:, 0, :]                                 # (TB, D)
        o = (jnp.dot(xi, w5s_ref[...], preferred_element_type=jnp.float32)
             + jnp.dot(y.astype(w5h_ref.dtype), w5h_ref[...],
                       preferred_element_type=jnp.float32)
             + b5_ref[...])
        out_ref[...] = o[:, None, :].astype(out_ref.dtype)


# ----------------------------------------------------------------------------
# Wrapper
# ----------------------------------------------------------------------------
def _round_up(v, m):
    return -(-v // m) * m


def io_b_forward(params, x, adj_col, i, num, node_size, *,
                 block_n=None, block_b=None,
                 compute_dtype=jnp.bfloat16,
                 vmem_tile_budget_bytes=24 * 1024 * 1024):
    """Pallas implementation of IO_B.forward.

    `num` / `node_size` only control the chunking of the reduction in the
    reference code; the result is identical to a full reduction over all
    nodes, so the Pallas grid uses its own node tile `block_n`.
    """
    del num, node_size  # chunking is math-equivalent to a full node reduction
    B, N, D = x.shape
    H = params["w2"].shape[0]

    cd = jnp.dtype(compute_dtype)
    # sub-32-bit dtypes pack 2 rows per sublane -> second-minor tile of 16
    rnd = 16 if cd.itemsize < 4 else 8

    # --- node tile: one big tile by default (rounded to a sublane multiple) ---
    if block_n is None:
        block_n = min(512, _round_up(N, rnd))
    block_n = max(rnd, _round_up(block_n, rnd))
    T = -(-N // block_n)
    N_pad = T * block_n

    # --- batch tile: target ~8192 rows of real work per grid step, but keep
    #     >= 2 batch blocks when B allows it so the "parallel" axis can shard
    #     across TensorCores (v7x); harmless on 1-TC chips. --------------------
    if block_b is None or block_b <= 0:
        target_rows = 8192
        block_b = max(1, min(32, -(-target_rows // block_n), B))
        if B >= 2:
            block_b = min(block_b, (B + 1) // 2)

    # --- VMEM budget with lane padding (D=8 -> 128 lanes is 16x, H=32 -> 4x):
    #     shrink tiles instead of spilling; stays safe on v7x's 64 MiB VMEM. ---
    LANE = 128
    def _tile_bytes(bb, bn):
        x_tile = bb * bn * LANE * cd.itemsize * 2      # double-buffered x tile
        interm = 3 * bb * bn * LANE * 4                # f32 h intermediates
        return x_tile + interm
    while _tile_bytes(block_b, block_n) > vmem_tile_budget_bytes:
        if block_b > 1:
            block_b = max(1, block_b // 2)
        elif block_n > rnd:
            block_n = max(rnd, _round_up(block_n // 2, rnd))
            T = -(-N // block_n)
            N_pad = T * block_n
        else:
            break

    B_pad = _round_up(B, block_b)
    GB = B_pad // block_b

    # --- glue (outside the kernel): gather row i, hoist the invariant term ----
    xi = x[:, i, :]                                          # (B, D) f32
    hi = xi @ params["w1i"] + params["b1"]                   # (B, H), includes b1
    xi3 = xi.reshape(B, 1, D).astype(cd)
    hi3 = hi.reshape(B, 1, H).astype(jnp.float32)

    # --- ragged node counts / batch padding: zero-pad; adj = 0 on pad rows and
    #     padded batch rows are sliced off -> exact result. --------------------
    xq = x.astype(cd)
    if N_pad != N:
        xq = jnp.pad(xq, ((0, 0), (0, N_pad - N), (0, 0)))
        adj_col = jnp.pad(adj_col, (0, N_pad - N))
    if B_pad != B:
        xq = jnp.pad(xq, ((0, B_pad - B), (0, 0), (0, 0)))
        xi3 = jnp.pad(xi3, ((0, B_pad - B), (0, 0), (0, 0)))
        hi3 = jnp.pad(hi3, ((0, B_pad - B), (0, 0), (0, 0)))
    adj2 = adj_col.reshape(T, block_n).astype(jnp.float32)   # lane-dense, resident

    w1x = params["w1x"].astype(cd)
    w2 = params["w2"].astype(cd)
    w3 = params["w3"].astype(cd)
    w4 = params["w4"].astype(cd)
    w5s = params["w5s"].astype(cd)
    w5h = params["w5h"].astype(cd)
    b2 = params["b2"].astype(jnp.float32)
    b3 = params["b3"].astype(jnp.float32)
    b4 = params["b4"].astype(jnp.float32)
    b5 = params["b5"].astype(jnp.float32)

    grid = (GB, T)
    const = lambda b, n: (0, 0)

    # NOTE: at production H, moving the epilogue (w3/w4/w5*) to a follow-up XLA
    # matmul and single-buffering constant specs would reclaim VMEM; at H=32 it
    # is noise, so both stay in-kernel / default-buffered.
    in_specs = [
        pl.BlockSpec((block_b, block_n, D), lambda b, n: (b, n, 0)),  # x tile
        pl.BlockSpec((T, block_n), const),                            # adj (resident)
        pl.BlockSpec((block_b, 1, D), lambda b, n: (b, 0, 0)),        # xi
        pl.BlockSpec((block_b, 1, H), lambda b, n: (b, 0, 0)),        # hoisted hi
        pl.BlockSpec((D, H), const),                                  # w1x
        pl.BlockSpec((H, H), const),                                  # w2
        pl.BlockSpec((1, H), const),                                  # b2
        pl.BlockSpec((H, H), const),                                  # w3
        pl.BlockSpec((1, H), const),                                  # b3
        pl.BlockSpec((H, H), const),                                  # w4
        pl.BlockSpec((1, H), const),                                  # b4
        pl.BlockSpec((D, D), const),                                  # w5s
        pl.BlockSpec((H, D), const),                                  # w5h
        pl.BlockSpec((1, D), const),                                  # b5
    ]
    # (block_b, 1, D) keeps the last two block dims equal to the full array
    # dims, so it lowers for any block_b (incl. block_b not a multiple of 8).
    out_specs = pl.BlockSpec((block_b, 1, D), lambda b, n: (b, 0, 0))

    out = pl.pallas_call(
        io_b_kernel,
        out_shape=jax.ShapeDtypeStruct((B_pad, 1, D), jnp.float32),
        grid_spec=pltpu.PrefetchScalarGridSpec(
            num_scalar_prefetch=0,
            grid=grid,
            in_specs=in_specs,
            out_specs=out_specs,
            scratch_shapes=[pltpu.VMEM((block_b, 1, H), jnp.float32)],
        ),
        compiler_params=pltpu.CompilerParams(
            # batch axis parallel (v7x 2nd TC), node axis is the reduction
            dimension_semantics=("parallel", "arbitrary"),
            # safe on v5e/v6e/v7x (v7x has only 64 MiB physical VMEM)
            vmem_limit_bytes=32 * 1024 * 1024,
        ),
    )(
        xq, adj2, xi3, hi3,
        w1x, w2, b2, w3, b3, w4, b4, w5s, w5h, b5,
    )
    return out.reshape(B_pad, D)[:B]


# ----------------------------------------------------------------------------
# Deterministic parameter init (mimics nn.Linear's U(-1/sqrt(fan_in), +...))
# ----------------------------------------------------------------------------
def init_params(key, dim, hid):
    def linear(k, fan_in, fan_out):
        kw, kb = jax.random.split(k)
        bound = 1.0 / jnp.sqrt(fan_in)
        # stored transposed: (fan_in, fan_out) so activations do  x @ W
        w = jax.random.uniform(kw, (fan_in, fan_out), jnp.float32, -bound, bound)
        b = jax.random.uniform(kb, (1, fan_out), jnp.float32, -bound, bound)
        return w, b

    k1, k2, k3, k4, k5 = jax.random.split(key, 5)
    w1, b1 = linear(k1, 2 * dim, hid)    # n2e
    w2, b2 = linear(k2, hid, hid)        # e2e
    w3, b3 = linear(k3, hid, hid)        # e2n
    w4, b4 = linear(k4, hid, hid)        # n2n
    w5, b5 = linear(k5, dim + hid, dim)  # output
    return {
        "w1x": w1[:dim], "w1i": w1[dim:], "b1": b1,    # split over the concat
        "w2": w2, "b2": b2,
        "w3": w3, "b3": b3,
        "w4": w4, "b4": b4,
        "w5s": w5[:dim], "w5h": w5[dim:], "b5": b5,    # split over the concat
    }


# ----------------------------------------------------------------------------
# Pure-JAX reference mirroring the PyTorch chunked loop exactly.
# ----------------------------------------------------------------------------
def io_b_reference(params, x, adj_col, i, num, node_size):
    B, N, D = x.shape
    starter = x[:, i, :]
    xi = x[:, i, :]
    w1 = jnp.concatenate([params["w1x"], params["w1i"]], axis=0)
    w5 = jnp.concatenate([params["w5s"], params["w5h"]], axis=0)
    total = 0.0
    for n in range(num + 1):
        lo = n * node_size
        hi = (n + 1) * node_size if n != num else N
        cur_x = x[:, lo:hi, :]
        cur_adj = adj_col[lo:hi]
        ender = jnp.broadcast_to(xi[:, None, :], cur_x.shape)
        c = jnp.concatenate([cur_x, ender], axis=2)
        c = jax.nn.relu(c @ w1 + params["b1"][0])
        c = jax.nn.relu(c @ params["w2"] + params["b2"][0])
        c = c * cur_adj[None, :, None]
        total = total + jnp.sum(c, axis=1)
    h = jax.nn.relu(total @ params["w3"] + params["b3"][0])
    h = jax.nn.relu(h @ params["w4"] + params["b4"][0])
    cat = jnp.concatenate([starter, h], axis=-1)
    return cat @ w5 + params["b5"][0]


if __name__ == "__main__":
    dim, hid = 8, 32
    params = init_params(jax.random.PRNGKey(42), dim, hid)
    key = jax.random.PRNGKey(0)

    # --- shared inputs ---------------------------------------------------------
    B, N, node_size, num, i = 2, 32, 8, 3, 3
    kx, ka, key = jax.random.split(key, 3)
    x = jax.random.normal(kx, (B, N, dim), jnp.float32)
    adj_col = jax.random.uniform(ka, (N,), jnp.float32)
    ref = io_b_reference(params, x, adj_col, i, num, node_size)

    # --- case 1: f32 compute, single node tile -> tight semantic check ----------
    out = io_b_forward(params, x, adj_col, i, num, node_size,
                       compute_dtype=jnp.float32)
    out = jax.block_until_ready(out)
    assert out.shape == (B, dim)
    assert jnp.allclose(out, ref, rtol=1e-3, atol=1e-3), (
        f"case1 mismatch: max abs diff {jnp.max(jnp.abs(out - ref))}")

    # --- case 2: f32, multi-tile node reduction + batch tile of 2 ---------------
    out2 = io_b_forward(params, x, adj_col, i, num, node_size,
                        block_n=8, block_b=2, compute_dtype=jnp.float32)
    out2 = jax.block_until_ready(out2)
    assert jnp.allclose(out2, ref, rtol=1e-3, atol=1e-3), (
        f"case2 mismatch: max abs diff {jnp.max(jnp.abs(out2 - ref))}")

    # --- case 3: default bf16 production path (loose tolerance) -----------------
    out3 = io_b_forward(params, x, adj_col, i, num, node_size)
    out3 = jax.block_until_ready(out3)
    assert jnp.allclose(out3, ref, rtol=5e-2, atol=1e-1), (
        f"case3 mismatch: max abs diff {jnp.max(jnp.abs(out3 - ref))}")

    # --- case 4: ragged N, ragged B (B=3 with block_b=2 -> batch padding) -------
    B4, N4, node_size4, num4, i4 = 3, 30, 8, 3, 5
    kx4, ka4, key = jax.random.split(key, 3)
    x4 = jax.random.normal(kx4, (B4, N4, dim), jnp.float32)
    adj4 = jax.random.uniform(ka4, (N4,), jnp.float32)
    ref4 = io_b_reference(params, x4, adj4, i4, num4, node_size4)

    out4 = io_b_forward(params, x4, adj4, i4, num4, node_size4,
                        block_b=2, compute_dtype=jnp.float32)
    out4 = jax.block_until_ready(out4)
    assert out4.shape == (B4, dim)
    assert jnp.allclose(out4, ref4, rtol=1e-3, atol=1e-3), (
        f"case4 mismatch: max abs diff {jnp.max(jnp.abs(out4 - ref4))}")

    out5 = io_b_forward(params, x4, adj4, i4, num4, node_size4, block_b=2)
    out5 = jax.block_until_ready(out5)
    assert jnp.allclose(out5, ref4, rtol=5e-2, atol=1e-1), (
        f"case5 mismatch: max abs diff {jnp.max(jnp.abs(out5 - ref4))}")

    print("KERNEL_OK")
</pallas_src>

<mosaic_0001>
module attributes {stable_mosaic.version = 11 : i64} {
  func.func @io_b_kernel(%arg0: i32, %arg1: i32, %arg2: memref<1x32x8xf32, #tpu.memory_space<vmem>>, %arg3: memref<1x32xf32, #tpu.memory_space<vmem>>, %arg4: memref<1x1x8xf32, #tpu.memory_space<vmem>>, %arg5: memref<1x1x32xf32, #tpu.memory_space<vmem>>, %arg6: memref<8x32xf32, #tpu.memory_space<vmem>>, %arg7: memref<32x32xf32, #tpu.memory_space<vmem>>, %arg8: memref<1x32xf32, #tpu.memory_space<vmem>>, %arg9: memref<32x32xf32, #tpu.memory_space<vmem>>, %arg10: memref<1x32xf32, #tpu.memory_space<vmem>>, %arg11: memref<32x32xf32, #tpu.memory_space<vmem>>, %arg12: memref<1x32xf32, #tpu.memory_space<vmem>>, %arg13: memref<8x8xf32, #tpu.memory_space<vmem>>, %arg14: memref<32x8xf32, #tpu.memory_space<vmem>>, %arg15: memref<1x8xf32, #tpu.memory_space<vmem>>, %arg16: memref<1x1x8xf32, #tpu.memory_space<vmem>>, %arg17: memref<1x1x32xf32, #tpu.memory_space<vmem>>) attributes {dimension_semantics = [#tpu.dimension_semantics<parallel>, #tpu.dimension_semantics<arbitrary>], iteration_bounds = array<i64: 2, 1>, scalar_prefetch = 0 : i64, scratch_operands = 1 : i64, tpu.core_type = #tpu.core_type<tc>, window_params = [{transform_indices = @transform_0, window_bounds = array<i64: 1, 32, 8>}, {pipeline_mode = #tpu.pipeline_mode<synchronous>, transform_indices = @transform_1, window_bounds = array<i64: 1, 32>}, {transform_indices = @transform_2, window_bounds = array<i64: 1, 1, 8>}, {transform_indices = @transform_3, window_bounds = array<i64: 1, 1, 32>}, {pipeline_mode = #tpu.pipeline_mode<synchronous>, transform_indices = @transform_4, window_bounds = array<i64: 8, 32>}, {pipeline_mode = #tpu.pipeline_mode<synchronous>, transform_indices = @transform_5, window_bounds = array<i64: 32, 32>}, {pipeline_mode = #tpu.pipeline_mode<synchronous>, transform_indices = @transform_6, window_bounds = array<i64: 1, 32>}, {pipeline_mode = #tpu.pipeline_mode<synchronous>, transform_indices = @transform_7, window_bounds = array<i64: 32, 32>}, {pipeline_mode = #tpu.pipeline_mode<synchronous>, transform_indices = @transform_8, window_bounds = array<i64: 1, 32>}, {pipeline_mode = #tpu.pipeline_mode<synchronous>, transform_indices = @transform_9, window_bounds = array<i64: 32, 32>}, {pipeline_mode = #tpu.pipeline_mode<synchronous>, transform_indices = @transform_10, window_bounds = array<i64: 1, 32>}, {pipeline_mode = #tpu.pipeline_mode<synchronous>, transform_indices = @transform_11, window_bounds = array<i64: 8, 8>}, {pipeline_mode = #tpu.pipeline_mode<synchronous>, transform_indices = @transform_12, window_bounds = array<i64: 32, 8>}, {pipeline_mode = #tpu.pipeline_mode<synchronous>, transform_indices = @transform_13, window_bounds = array<i64: 1, 8>}, {transform_indices = @transform_14, window_bounds = array<i64: 1, 1, 8>}]} {
    %c0_i32 = arith.constant 0 : i32
    %0 = arith.cmpi eq, %arg1, %c0_i32 : i32
    %1 = arith.extui %0 : i1 to i32
    %c0_i32_0 = arith.constant 0 : i32
    %2 = arith.cmpi ne, %1, %c0_i32_0 : i32
    scf.if %2 {
      %cst_25 = arith.constant 0.000000e+00 : f32
      %35 = vector.broadcast %cst_25 : f32 to vector<1x1x32xf32>
      %c0_26 = arith.constant 0 : index
      %c0_27 = arith.constant 0 : index
      %c0_28 = arith.constant 0 : index
      %36 = vector.load %arg17[%c0_26, %c0_27, %c0_28] : memref<1x1x32xf32, #tpu.memory_space<vmem>>, vector<1x1x32xf32>
      tpu.vector_store %arg17[%c0_26, %c0_27, %c0_28], %35 {strides = array<i32>} : memref<1x1x32xf32, #tpu.memory_space<vmem>>, vector<1x1x32xf32>,
    } else {
    }
    %c0 = arith.constant 0 : index
    %c0_1 = arith.constant 0 : index
    %c0_2 = arith.constant 0 : index
    %3 = vector.load %arg2[%c0, %c0_1, %c0_2] : memref<1x32x8xf32, #tpu.memory_space<vmem>>, vector<1x32x8xf32>
    %4 = vector.shape_cast %3 : vector<1x32x8xf32> to vector<32x8xf32>
    %c0_3 = arith.constant 0 : index
    %c0_4 = arith.constant 0 : index
    %5 = vector.load %arg6[%c0_3, %c0_4] : memref<8x32xf32, #tpu.memory_space<vmem>>, vector<8x32xf32>
    %cst = arith.constant dense<0.000000e+00> : vector<32x32xf32>
    %6 = tpu.matmul %4, %5, %cst {dimension_numbers = #tpu.dot_dimension_numbers<[1], [0], [0], [1], [0, 0, 1, 1], [], []>} : vector<32x8xf32>, vector<8x32xf32>, vector<32x32xf32> -> vector<32x32xf32>
    %7 = vector.shape_cast %6 : vector<32x32xf32> to vector<1x32x32xf32>
    %c0_5 = arith.constant 0 : index
    %c0_6 = arith.constant 0 : index
    %c0_7 = arith.constant 0 : index
    %8 = vector.load %arg5[%c0_5, %c0_6, %c0_7] : memref<1x1x32xf32, #tpu.memory_space<vmem>>, vector<1x1x32xf32>
    %9 = vector.broadcast %8 : vector<1x1x32xf32> to vector<1x32x32xf32>
    %10 = arith.addf %7, %9 : vector<1x32x32xf32>
    %cst_8 = arith.constant 0.000000e+00 : f32
    %11 = vector.broadcast %cst_8 : f32 to vector<1x32x32xf32>
    %12 = arith.maximumf %10, %11 : vector<1x32x32xf32>
    %13 = vector.shape_cast %12 : vector<1x32x32xf32> to vector<32x32xf32>
    %c0_9 = arith.constant 0 : index
    %c0_10 = arith.constant 0 : index
    %14 = vector.load %arg7[%c0_9, %c0_10] : memref<32x32xf32, #tpu.memory_space<vmem>>, vector<32x32xf32>
    %cst_11 = arith.constant dense<0.000000e+00> : vector<32x32xf32>
    %15 = tpu.matmul %13, %14, %cst_11 {dimension_numbers = #tpu.dot_dimension_numbers<[1], [0], [0], [1], [0, 0, 1, 1], [], []>} : vector<32x32xf32>, vector<32x32xf32>, vector<32x32xf32> -> vector<32x32xf32>
    %c0_12 = arith.constant 0 : index
    %c0_13 = arith.constant 0 : index
    %16 = vector.load %arg8[%c0_12, %c0_13] : memref<1x32xf32, #tpu.memory_space<vmem>>, vector<1x32xf32>
    %17 = vector.broadcast %16 : vector<1x32xf32> to vector<32x32xf32>
    %18 = arith.addf %15, %17 : vector<32x32xf32>
    %cst_14 = arith.constant 0.000000e+00 : f32
    %19 = vector.broadcast %cst_14 : f32 to vector<32x32xf32>
    %20 = arith.maximumf %18, %19 : vector<32x32xf32>
    %21 = vector.shape_cast %20 : vector<32x32xf32> to vector<1x32x32xf32>
    %22 = arith.index_cast %arg1 : i32 to index
    %c0_15 = arith.constant 0 : index
    %23 = vector.load %arg3[%22, %c0_15] : memref<1x32xf32, #tpu.memory_space<vmem>>, vector<1x32xf32>
    %c0_16 = arith.constant 0 : index
    %c0_17 = arith.constant 0 : index
    %c0_18 = arith.constant 0 : index
    %24 = vector.load %arg17[%c0_16, %c0_17, %c0_18] : memref<1x1x32xf32, #tpu.memory_space<vmem>>, vector<1x1x32xf32>
    %25 = vector.shape_cast %23 : vector<1x32xf32> to vector<1x32x1xf32>
    %26 = vector.broadcast %25 : vector<1x32x1xf32> to vector<1x32x32xf32>
    %27 = arith.mulf %21, %26 : vector<1x32x32xf32>
    %cst_19 = arith.constant dense<0.000000e+00> : vector<1x32xf32>
    %28 = vector.multi_reduction <add>, %27, %cst_19 [1] : vector<1x32x32xf32> to vector<1x32xf32>
    %29 = vector.shape_cast %28 : vector<1x32xf32> to vector<1x1x32xf32>
    %30 = arith.addf %24, %29 : vector<1x1x32xf32>
    %c0_20 = arith.constant 0 : index
    %c0_21 = arith.constant 0 : index
    %c0_22 = arith.constant 0 : index
    %31 = vector.load %arg17[%c0_20, %c0_21, %c0_22] : memref<1x1x32xf32, #tpu.memory_space<vmem>>, vector<1x1x32xf32>
    tpu.vector_store %arg17[%c0_20, %c0_21, %c0_22], %30 {strides = array<i32>} : memref<1x1x32xf32, #tpu.memory_space<vmem>>, vector<1x1x32xf32>,
    %c0_i32_23 = arith.constant 0 : i32
    %32 = arith.cmpi eq, %arg1, %c0_i32_23 : i32
    %33 = arith.extui %32 : i1 to i32
    %c0_i32_24 = arith.constant 0 : i32
    %34 = arith.cmpi ne, %33, %c0_i32_24 : i32
    scf.if %34 {
      %c0_25 = arith.constant 0 : index
      %c0_26 = arith.constant 0 : index
      %c0_27 = arith.constant 0 : index
      %35 = vector.load %arg17[%c0_25, %c0_26, %c0_27] : memref<1x1x32xf32, #tpu.memory_space<vmem>>, vector<1x1x32xf32>
      %36 = vector.shape_cast %35 : vector<1x1x32xf32> to vector<1x32xf32>
      %c0_28 = arith.constant 0 : index
      %c0_29 = arith.constant 0 : index
      %37 = vector.load %arg9[%c0_28, %c0_29] : memref<32x32xf32, #tpu.memory_space<vmem>>, vector<32x32xf32>
      %cst_30 = arith.constant dense<0.000000e+00> : vector<1x32xf32>
      %38 = tpu.matmul %36, %37, %cst_30 {dimension_numbers = #tpu.dot_dimension_numbers<[1], [0], [0], [1], [0, 0, 1, 1], [], []>} : vector<1x32xf32>, vector<32x32xf32>, vector<1x32xf32> -> vector<1x32xf32>
      %c0_31 = arith.constant 0 : index
      %c0_32 = arith.constant 0 : index
      %39 = vector.load %arg10[%c0_31, %c0_32] : memref<1x32xf32, #tpu.memory_space<vmem>>, vector<1x32xf32>
      %40 = arith.addf %38, %39 : vector<1x32xf32>
      %cst_33 = arith.constant 0.000000e+00 : f32
      %41 = vector.broadcast %cst_33 : f32 to vector<1x32xf32>
      %42 = arith.maximumf %40, %41 : vector<1x32xf32>
      %c0_34 = arith.constant 0 : index
      %c0_35 = arith.constant 0 : index
      %43 = vector.load %arg11[%c0_34, %c0_35] : memref<32x32xf32, #tpu.memory_space<vmem>>, vector<32x32xf32>
      %cst_36 = arith.constant dense<0.000000e+00> : vector<1x32xf32>
      %44 = tpu.matmul %42, %43, %cst_36 {dimension_numbers = #tpu.dot_dimension_numbers<[1], [0], [0], [1], [0, 0, 1, 1], [], []>} : vector<1x32xf32>, vector<32x32xf32>, vector<1x32xf32> -> vector<1x32xf32>
      %c0_37 = arith.constant 0 : index
      %c0_38 = arith.constant 0 : index
      %45 = vector.load %arg12[%c0_37, %c0_38] : memref<1x32xf32, #tpu.memory_space<vmem>>, vector<1x32xf32>
      %46 = arith.addf %44, %45 : vector<1x32xf32>
      %cst_39 = arith.constant 0.000000e+00 : f32
      %47 = vector.broadcast %cst_39 : f32 to vector<1x32xf32>
      %48 = arith.maximumf %46, %47 : vector<1x32xf32>
      %c0_40 = arith.constant 0 : index
      %c0_41 = arith.constant 0 : index
      %c0_42 = arith.constant 0 : index
      %49 = vector.load %arg4[%c0_40, %c0_41, %c0_42] : memref<1x1x8xf32, #tpu.memory_space<vmem>>, vector<1x1x8xf32>
      %50 = vector.shape_cast %49 : vector<1x1x8xf32> to vector<1x8xf32>
      %c0_43 = arith.constant 0 : index
      %c0_44 = arith.constant 0 : index
      %51 = vector.load %arg13[%c0_43, %c0_44] : memref<8x8xf32, #tpu.memory_space<vmem>>, vector<8x8xf32>
      %cst_45 = arith.constant dense<0.000000e+00> : vector<1x8xf32>
      %52 = tpu.matmul %50, %51, %cst_45 {dimension_numbers = #tpu.dot_dimension_numbers<[1], [0], [0], [1], [0, 0, 1, 1], [], []>} : vector<1x8xf32>, vector<8x8xf32>, vector<1x8xf32> -> vector<1x8xf32>
      %c0_46 = arith.constant 0 : index
      %c0_47 = arith.constant 0 : index
      %53 = vector.load %arg14[%c0_46, %c0_47] : memref<32x8xf32, #tpu.memory_space<vmem>>, vector<32x8xf32>
      %cst_48 = arith.constant dense<0.000000e+00> : vector<1x8xf32>
      %54 = tpu.matmul %48, %53, %cst_48 {dimension_numbers = #tpu.dot_dimension_numbers<[1], [0], [0], [1], [0, 0, 1, 1], [], []>} : vector<1x32xf32>, vector<32x8xf32>, vector<1x8xf32> -> vector<1x8xf32>
      %55 = arith.addf %52, %54 : vector<1x8xf32>
      %c0_49 = arith.constant 0 : index
      %c0_50 = arith.constant 0 : index
      %56 = vector.load %arg15[%c0_49, %c0_50] : memref<1x8xf32, #tpu.memory_space<vmem>>, vector<1x8xf32>
      %57 = arith.addf %55, %56 : vector<1x8xf32>
      %58 = vector.shape_cast %57 : vector<1x8xf32> to vector<1x1x8xf32>
      %c0_51 = arith.constant 0 : index
      %c0_52 = arith.constant 0 : index
      %c0_53 = arith.constant 0 : index
      %59 = vector.load %arg16[%c0_51, %c0_52, %c0_53] : memref<1x1x8xf32, #tpu.memory_space<vmem>>, vector<1x1x8xf32>
      tpu.vector_store %arg16[%c0_51, %c0_52, %c0_53], %58 {strides = array<i32>} : memref<1x1x8xf32, #tpu.memory_space<vmem>>, vector<1x1x8xf32>,
    } else {
    }
    return
  }
  func.func @transform_0(%arg0: i32, %arg1: i32) -> (i32, i32, i32) {
    %c0_i32 = arith.constant 0 : i32
    %c0_i32_0 = arith.constant 0 : i32
    return %arg0, %arg1, %c0_i32 : i32, i32, i32
  }
  func.func @transform_1(%arg0: i32, %arg1: i32) -> (i32, i32) {
    %c0_i32 = arith.constant 0 : i32
    %c0_i32_0 = arith.constant 0 : i32
    %c0_i32_1 = arith.constant 0 : i32
    return %c0_i32, %c0_i32_0 : i32, i32
  }
  func.func @transform_2(%arg0: i32, %arg1: i32) -> (i32, i32, i32) {
    %c0_i32 = arith.constant 0 : i32
    %c0_i32_0 = arith.constant 0 : i32
    %c0_i32_1 = arith.constant 0 : i32
    return %arg0, %c0_i32, %c0_i32_0 : i32, i32, i32
  }
  func.func @transform_3(%arg0: i32, %arg1: i32) -> (i32, i32, i32) {
    %c0_i32 = arith.constant 0 : i32
    %c0_i32_0 = arith.constant 0 : i32
    %c0_i32_1 = arith.constant 0 : i32
    return %arg0, %c0_i32, %c0_i32_0 : i32, i32, i32
  }
  func.func @transform_4(%arg0: i32, %arg1: i32) -> (i32, i32) {
    %c0_i32 = arith.constant 0 : i32
    %c0_i32_0 = arith.constant 0 : i32
    %c0_i32_1 = arith.constant 0 : i32
    return %c0_i32, %c0_i32_0 : i32, i32
  }
  func.func @transform_5(%arg0: i32, %arg1: i32) -> (i32, i32) {
    %c0_i32 = arith.constant 0 : i32
    %c0_i32_0 = arith.constant 0 : i32
    %c0_i32_1 = arith.constant 0 : i32
    return %c0_i32, %c0_i32_0 : i32, i32
  }
  func.func @transform_6(%arg0: i32, %arg1: i32) -> (i32, i32) {
    %c0_i32 = arith.constant 0 : i32
    %c0_i32_0 = arith.constant 0 : i32
    %c0_i32_1 = arith.constant 0 : i32
    return %c0_i32, %c0_i32_0 : i32, i32
  }
  func.func @transform_7(%arg0: i32, %arg1: i32) -> (i32, i32) {
    %c0_i32 = arith.constant 0 : i32
    %c0_i32_0 = arith.constant 0 : i32
    %c0_i32_1 = arith.constant 0 : i32
    return %c0_i32, %c0_i32_0 : i32, i32
  }
  func.func @transform_8(%arg0: i32, %arg1: i32) -> (i32, i32) {
    %c0_i32 = arith.constant 0 : i32
    %c0_i32_0 = arith.constant 0 : i32
    %c0_i32_1 = arith.constant 0 : i32
    return %c0_i32, %c0_i32_0 : i32, i32
  }
  func.func @transform_9(%arg0: i32, %arg1: i32) -> (i32, i32) {
    %c0_i32 = arith.constant 0 : i32
    %c0_i32_0 = arith.constant 0 : i32
    %c0_i32_1 = arith.constant 0 : i32
    return %c0_i32, %c0_i32_0 : i32, i32
  }
  func.func @transform_10(%arg0: i32, %arg1: i32) -> (i32, i32) {
    %c0_i32 = arith.constant 0 : i32
    %c0_i32_0 = arith.constant 0 : i32
    %c0_i32_1 = arith.constant 0 : i32
    return %c0_i32, %c0_i32_0 : i32, i32
  }
  func.func @transform_11(%arg0: i32, %arg1: i32) -> (i32, i32) {
    %c0_i32 = arith.constant 0 : i32
    %c0_i32_0 = arith.constant 0 : i32
    %c0_i32_1 = arith.constant 0 : i32
    return %c0_i32, %c0_i32_0 : i32, i32
  }
  func.func @transform_12(%arg0: i32, %arg1: i32) -> (i32, i32) {
    %c0_i32 = arith.constant 0 : i32
    %c0_i32_0 = arith.constant 0 : i32
    %c0_i32_1 = arith.constant 0 : i32
    return %c0_i32, %c0_i32_0 : i32, i32
  }
  func.func @transform_13(%arg0: i32, %arg1: i32) -> (i32, i32) {
    %c0_i32 = arith.constant 0 : i32
    %c0_i32_0 = arith.constant 0 : i32
    %c0_i32_1 = arith.constant 0 : i32
    return %c0_i32, %c0_i32_0 : i32, i32
  }
  func.func @transform_14(%arg0: i32, %arg1: i32) -> (i32, i32, i32) {
    %c0_i32 = arith.constant 0 : i32
    %c0_i32_0 = arith.constant 0 : i32
    %c0_i32_1 = arith.constant 0 : i32
    return %arg0, %c0_i32, %c0_i32_0 : i32, i32, i32
  }
}

</mosaic_0001>

<bundles_post_ra>
// kernel: tpu_custom_call.1
= control target key start
LH: loop header
LB: loop body
LE: loop exit
PB: predicated region body
PF: predicated region fallthrough
CT: control target
= control target key end

     0   :  { %s1804_s0 = inlined_call_operand.vmem [shape: f32[2,32,8], index: 0, kind: input, shape index: {}]   ;;  %s1805_s1 = inlined_call_operand.vmem [shape: f32[1,32], index: 1, kind: input, shape index: {}]   ;;  %s1806_s2 = inlined_call_operand.vmem [shape: f32[2,1,8], index: 2, kind: input, shape index: {}]   ;;  %s1807_s3 = inlined_call_operand.vmem [shape: f32[2,1,32], index: 3, kind: input, shape index: {}]   ;;  %s1808_s4 = inlined_call_operand.vmem [shape: f32[8,32], index: 4, kind: input, shape index: {}]   ;;  %s1809_s5 = inlined_call_operand.vmem [shape: f32[32,32], index: 5, kind: input, shape index: {}]   ;;  %s1810_s6 = inlined_call_operand.vmem [shape: f32[1,32], index: 6, kind: input, shape index: {}]   ;;  %s1811_s7 = inlined_call_operand.vmem [shape: f32[32,32], index: 7, kind: input, shape index: {}]   ;;  %s1812_s8 = inlined_call_operand.vmem [shape: f32[1,32], index: 8, kind: input, shape index: {}]   ;;  %s1813_s9 = inlined_call_operand.vmem [shape: f32[32,32], index: 9, kind: input, shape index: {}]   ;;  %s1814_s10 = inlined_call_operand.vmem [shape: f32[1,32], index: 10, kind: input, shape index: {}]   ;;  %s1815_s11 = inlined_call_operand.vmem [shape: f32[8,8], index: 11, kind: input, shape index: {}]   ;;  %s1816_s12 = inlined_call_operand.vmem [shape: f32[32,8], index: 12, kind: input, shape index: {}]   ;;  %s1817_s13 = inlined_call_operand.vmem [shape: f32[1,8], index: 13, kind: input, shape index: {}]   ;;  %s1818_s14 = inlined_call_operand.hbm [shape: f32[2,1,8], index: 14, kind: output, shape index: {}]  }
   0x1   :  { %1821 = sst [smem:[#allocation8_spill]] %s1804_s0 }
   0x2   :  { %1822 = sst [smem:[#allocation9_spill]] %s1805_s1 }
   0x3   :  { %1823 = sst [smem:[#allocation10_spill]] %s1808_s4 }
   0x4   :  { %19 = vsyncpa [#allocation4], 0 }
   0x5   :  { %21 = vsyncpa [#allocation4 + $0x1], 0  ;;  %s1578_s29 = smov 0   ;;  %s1580_s30 = smov 0  }
   0x6   :  { %s1582_s15 = smov 0   ;;  %s1584_s16 = smov 0  }
   0x7   :  { %s1586_s17 = smov 0   ;;  %s1588_s18 = smov 0  }
   0x8 LB: > { %1824 = sst [smem:[#allocation6_spill]] %s1493_s17  ;;  %s1219_s19 = sadd.s32 4294967295, %s1497_s18   ;;  %s1497_s18 = sphi %s1588_s18, %s27_s18   ;;  %s1493_s17 = sphi %s1586_s17, %s1832_s17   ;;  %s1489_s16 = sphi %s1584_s16, %s1831_s16   ;;  %s1485_s15 = sphi %s1582_s15, %s1835_s15   ;;  %s1481_s30 = sphi %s1580_s30, %s1834_s30   ;;  %s1477_s29 = sphi %s1578_s29, %s1833_s29  }
   0x9   : > { %s1220_s20 = sadd.s32 4294967294, %s1497_s18   ;;  %s39_s21 = sadd.s32 1, %s1493_s17 }
   0xa   : > { %s357_s22 = sadd.s32 1, %s1485_s15  ;;  %p41_p0 = scmp.ge.s32.totalorder %s39_s21, 2 }
   0xb   : > { %p367_p1 = scmp.ne.s32.totalorder %s1485_s15, %s1481_s30  ;;  %p368_p2 = scmp.eq.s32.totalorder %s1219_s19, 1 }
   0xc   : > { %p373_p3 = scmp.ne.s32.totalorder %s1481_s30, %s1477_s29  ;;  %s1837_s21 = smov (%p41_p0, %s39_s21), 0 }
   0xd   : > { %1825 = sst [smem:[#allocation7_spill]] %s1837_s21  ;;  %p1618_p4 = por %p368_p2, %p367_p1 }
   0xe   : > { %p374_p5 = scmp.eq.s32.totalorder %s1220_s20, 1  ;;  %s354_s24 = ssub.s32 %s1493_s17, %s1837_s21 }
   0xf   : > { %p1223_p6 = scmp.ge.s32.totalorder %s1497_s18, 1  ;;  %p355_p7 = scmp.eq.s32.totalorder %s354_s24, 0 }
  0x10   : > { %p1625_p8 = por %p374_p5, %p373_p3  ;;  %p450_p9 = scmp.lt.s32.totalorder %s1497_s18, 3 }
  0x11   : > { %s1631_s26 = scalar_select %p355_p7, %s1485_s15, %s357_s22  }
  0x12   : > { %p451_p10 = pnand %p1223_p6, %p450_p9 }
  0x13   : > { %s1828_s4 = sld [smem:[#allocation10_spill]] (!%p451_p10)  ;;  %p506_p11 = scmp.lt.s32.totalorder (!%p451_p10), %s1489_s16, 1  ;;  %v645_v1 = vld [vmem:[%s1809_s5] sm:$0xff] (!%p451_p10)  ;;  %v646_v2 = vld [vmem:[%s1809_s5 + $0x8] sm:$0xff] (!%p451_p10)  ;;  %vm532_vm0 = vcmask (!%p451_p10), 64512   ;;  %v647_v8 = vld [vmem:[%s1809_s5 + $0x10] sm:$0xff] (!%p451_p10) }
  0x14   : > { %454 = sbr.rel (%p451_p10) target bundleno = 1163 (0x48b), region = 76  ;;  %v1335_v3 = vpack.c.bf16 (!%p451_p10), %v646_v2, %v645_v1  ;;  %s1829_s0 = sld [smem:[#allocation8_spill]] (!%p451_p10)  ;;  %v648_v9 = vld [vmem:[%s1809_s5 + $0x18] sm:$0xff] (!%p451_p10)  ;;  %vm656_vm1 = vcmask (!%p451_p10), 261120   ;;  %vm525_vm2 = vcmask (!%p451_p10), 253952   ;;  %v1499_v25 = vmov (!%p451_p10), 0.0  }
  0x15   : > { %v1339_v10 = vpack.c.bf16 (!%p451_p10), %v648_v9, %v647_v8  ;;  %s1830_s1 = sld [smem:[#allocation9_spill]] (!%p451_p10)  ;;  %526 = vst.msk [vmem:[#allocation2] sm:$0x1] (!%p451_p10), %vm525_vm2, %v1499_v25  ;;  %v804_v26 = vld [vmem:[%s1811_s7] sm:$0xff] (!%p451_p10)  ;;  %v805_v27 = vld [vmem:[%s1811_s7 + $0x8] sm:$0xff] (!%p451_p10)  ;;  %v806_v28 = vld [vmem:[%s1811_s7 + $0x10] sm:$0xff] (!%p451_p10) }
  0x16   : > { %1336 = vmatprep.subr.bf16.mxu1 (!%p451_p10), %v1335_v3  ;;  %v1500_v29 = vmov (!%p451_p10), 0.0|0.0   ;;  %v1344_v30 = vpack.c.bf16 (!%p451_p10), %v805_v27, %v804_v26  ;;  %v807_v31 = vld [vmem:[%s1811_s7 + $0x18] sm:$0xff] (!%p451_p10)  ;;  %vm1501_vm3 = vmmov (!%p451_p10), 0   ;;  %v883_v33 = vld [vmem:[%s1813_s9] sm:$0xff] (!%p451_p10)  ;;  %v884_v34 = vld [vmem:[%s1813_s9 + $0x8] sm:$0xff] (!%p451_p10)  ;;  %vm1116_vm4 = vcmask (!%p451_p10), 57344  }
  0x17   : > { %1338 = vmatpush3.bf16.msra.mxu1 (!%p451_p10), %v1335_v3  ;;  %v1347_v32 = vpack.c.bf16 (!%p451_p10), %v807_v31, %v806_v28  ;;  %v1350_v35 = vpack.c.bf16 (!%p451_p10), %v884_v34, %v883_v33  ;;  %v1231_v37 = vld [vmem:[%s1810_s6] ss:$0 sm:$0xff] (!%p451_p10)  ;;  %v885_v9 = vld [vmem:[%s1813_s9 + $0x10] sm:$0xff] (!%p451_p10) }
  0x18   : > { %1340 = vmatprep.subr.bf16.mxu1 (!%p451_p10), %v1339_v10  ;;  %v1114_v33 = vld [vmem:[%s1817_s13] sm:$0x1] (!%p451_p10) }
  0x19   : > { %v531_v0 = vld [vmem:[%s1828_s4] sm:$0xff] (!%p451_p10)  ;;  %s503_s4 = sand.u32 (!%p451_p10), 1, %s1481_s30  }
  0x1a   : > { %1275 = vmatprep.subr.mxu0 (!%p451_p10), %v531_v0  ;;  %s1119_s20 = scalar_lea.sflag (!%p451_p10), [#allocation4], %s503_s4 }
  0x1b   : > { %1276 = vmatpush3.msra.mxu0 %v531_v0  ;;  %s1644_s22 = scalar_select %p506_p11, %s1489_s16, 1  ;;  %1342 = vmatpush3.bf16.msra.mxu1 %v1339_v10  ;;  %v1236_v11 = vld [vmem:[%s1830_s1] ss:$0 sm:$0xff]  ;;  %v886_v10 = vld [vmem:[%s1813_s9 + $0x18] sm:$0xff] }
  0x1c   : > { %766 = vbcast.lane.b32.xlu0 %v1236_v11, 256  ;;  %774 = vbcast.lane.b32.xlu1 %v1236_v11, 272 }
  0x1d   : > { %s1244_s27 = sshll.u32 %s1644_s22, 5  ;;  %s520_s21 = scalar_lea.vmem %s1807_s3, %s1644_s22  ;;  %1343 = vmatprep.subr.bf16.mxu0 %v1500_v29  ;;  %1349 = vmatprep.subr.bf16.mxu1 %v1500_v29 }
  0x1e   : > { %s513_s17 = scalar_lea.vmem %s1829_s0, %s1244_s27  ;;  %v1230_v12 = vld [vmem:[%s520_s21] ss:$0 sm:$0xff]  ;;  %s517_s0 = scalar_lea.vmem %s1806_s2, %s1644_s22 }
  0x1f   : > { %v527_v4 = vld [vmem:[%s513_s17] sm:$0xff]  ;;  %v528_v5 = vld [vmem:[%s513_s17 + $0x8] sm:$0xff]  ;;  %v529_v6 = vld [vmem:[%s513_s17 + $0x10] sm:$0xff]  ;;  %s504_s27 = scalar_lea.vmem [#allocation3], %s503_s4 }
  0x20   : > { %1277 = vmatprep.mubr.msk.f32.mxu0 %vm532_vm0, %v527_v4  ;;  %v530_v7 = vld [vmem:[%s513_s17 + $0x18] sm:$0xff]  ;;  %770 = vbcast.lane.b32.xlu0 %v1236_v11, 264  ;;  %s1131_s17 = sshll.u32 %s504_s27, 4  ;;  %s1759_s17 = int_to_ptr.vmem [resolvable:$true] %s1131_s17 }
  0x21   : > { %1278 = vmatmul.mubr.msk.f32.vlgmr.msra.gmra.mrb[0].mxu0 %vm532_vm0, %v528_v5  ;;  %778 = vbcast.lane.b32.xlu1 %v1236_v11, 280  ;;  %v760_v5 = vld [vmem:[#allocation2] sm:$0x1]  ;;  %v1353_v11 = vpack.c.bf16 %v886_v10, %v885_v9  ;;  %s1419_s22 = scalar_lea.vmem %s1759_s17, 16 }
  0x22   : > { %1280 = vmatprep.mubr.msk.f32.mxu0 %vm532_vm0, %v529_v6  ;;  %1345 = vmatpush3.bf16.msra.mxu0 %v1344_v30  ;;  %p1420_p12 = scmp.ne.s32.totalorder %s1759_s17, %s1419_s22 }
  0x23   : > { %1346 = vmatprep.subr.bf16.mxu0 %v1500_v29 }
  0x24   : > { %p1421_p13 = pnand %p1420_p12, %p1618_p4 }
  0x25   : > { %1281 = vmatmul.mubr.msk.f32.gmra.mrb[2].mxu0 %vm532_vm0, %v530_v7 }
  0x26   : > { %1305 = vmatprep.mubr.msk.f32.mxu0 %vm1501_vm3, %v1499_v25  ;;  %1348 = vmatpush3.bf16.msra.mxu0 %v1347_v32  ;;  %p1422_p0 = pneg %p1421_p13 }
  0x27   : > { %1355 = vmatprep.subr.bf16.mxu0 %v1500_v29 }
  0x8e   : > { %v767_v36 = vpop.permute.xlu0 %766  ;;  %v775_v41 = vpop.permute.xlu1 %774 }
  0x92   : > { %v771_v43 = vpop.permute.xlu0 %770 }
  0x93   : > { %v779_v54 = vpop.permute.xlu1 %778 }
  0xf4   : > { %v1279_v13 = vpop.f32.mrb[0].mxu0 }
  0xf5   : > { %v638_v14 = vadd.f32 %v1279_v13, %v1230_v12  ;;  %v611_v15 = vpop.f32.mrb[1].mxu0  ;;  %v965_v13 = vld [vmem:[%s1816_s12 + $0x8] sm:$0xff] }
  0xf6   : > { %v637_v16 = vadd.f32 %v1230_v12, %v611_v15  ;;  %v808_v15 = vld [vmem:[%s1812_s8] sm:$0x1] }
  0xf7   : > { %v642_v19 = vmax.f32 %v638_v14, 0.0 }
  0xf8   : > { %v641_v17 = vmax.f32 %v637_v16, 0.0  ;;  %v1282_v18 = vpop.f32.mrb[2].mxu0 }
  0xf9   : > { %v640_v20 = vadd.f32 %v1282_v18, %v1230_v12  ;;  %v621_v21 = vpop.f32.mrb[3].mxu0 }
  0xfa   : > { %v639_v22 = vadd.f32 %v1230_v12, %v621_v21  ;;  %1291 = vmatprep.mubr.msk.f32.mxu1 %vm656_vm1, %v641_v17  ;;  %v964_v12 = vld [vmem:[%s1816_s12] sm:$0xff]  ;;  %v967_v21 = vld [vmem:[%s1816_s12 + $0x18] sm:$0xff] }
  0xfb   : > { %1292 = vmatmul.mubr.msk.f32.vlgmr.msra.gmra.mrb[0].mxu1 %vm656_vm1, %v642_v19  ;;  %v644_v24 = vmax.f32 %v640_v20, 0.0  ;;  %v1356_v14 = vpack.c.bf16 %v965_v13, %v964_v12  ;;  %v966_v20 = vld [vmem:[%s1816_s12 + $0x10] sm:$0xff] }
  0xfc   : > { %v643_v23 = vmax.f32 %v639_v22, 0.0  ;;  %1351 = vmatpush3.bf16.msra.mxu1 %v1350_v35  ;;  %v1359_v22 = vpack.c.bf16 %v967_v21, %v966_v20 }
  0xfd   : > { %1352 = vmatprep.subr.bf16.mxu1 %v1500_v29 }
  0xfe   : > { %1294 = vmatprep.mubr.msk.f32.mxu1 %vm656_vm1, %v643_v23  ;;  %v963_v23 = vld [vmem:[%s1815_s11] sm:$0xff] }
  0xff   : > { %1295 = vmatmul.mubr.msk.f32.gmra.mrb[2].mxu1 %vm656_vm1, %v644_v24  ;;  %v962_v24 = vld [vmem:[%s517_s0] sm:$0x1]  ;;  %s1241_s0 = sshll.u32 %s1489_s16, 4  ;;  %s1502_s16 = smov [#allocation3]  }
 0x100   : > { %1316 = vmatprep.mubr.msk.f32.mxu1 %vm1501_vm3, %v1499_v25  ;;  %1354 = vmatpush3.bf16.msra.mxu1 %v1353_v11  ;;  %s1757_s19 = scalar_lea.hbm %s1818_s14, %s1241_s0  ;;  %s1423_s24 = sshll.u32 %s1502_s16, 4  ;;  %s1424_s24 = int_to_ptr.vmem [resolvable:$false] %s1423_s24 }
 0x101   : > { %1330 = vmatprep.subr.mxu1 %v1499_v25  ;;  %s1425_s1 = scalar_lea.vmem %s1424_s24, 32  ;;  %p1426_p1 = scmp.lt.s32.totalorder %s1759_s17, %s1424_s24 }
 0x102   : > { %p1427_p2 = scmp.lt.s32.totalorder %s1425_s1, %s1419_s22 }
 0x104   : > { %p1428_p3 = por %p1427_p2, %p1426_p1 }
 0x106   : > { %p1429_p5 = pnand %p1428_p3, %p1422_p0 }
 0x1ce   : > { %v1293_v38 = vpop.f32.mrb[0].mxu1 }
 0x1cf   : > { %v741_v39 = vadd.f32 %v1293_v38, %v1231_v37  ;;  %v735_v40 = vpop.f32.mrb[1].mxu1 }
 0x1d0   : > { %v736_v42 = vadd.f32 %v1231_v37, %v735_v40 }
 0x1d1   : > { %v755_v44 = vmax.f32 %v741_v39, 0.0 }
 0x1d2   : > { %v754_v45 = vmax.f32 %v736_v42, 0.0  ;;  %v1296_v46 = vpop.f32.mrb[2].mxu1 }
 0x1d3   : > { %v781_v47 = vmul.f32 %v771_v43, %v755_v44  ;;  %v751_v48 = vadd.f32 %v1296_v46, %v1231_v37  ;;  %v745_v49 = vpop.f32.mrb[3].mxu1 }
 0x1d4   : > { %v780_v50 = vmul.f32 %v767_v36, %v754_v45  ;;  %v746_v51 = vadd.f32 %v1231_v37, %v745_v49 }
 0x1d5   : > { %v785_v52 = vsel %vm656_vm1, %v781_v47, 0.0  ;;  %v757_v53 = vmax.f32 %v751_v48, 0.0 }
 0x1d6   : > { %v784_v55 = vsel %vm656_vm1, %v780_v50, 0.0  ;;  %v756_v56 = vmax.f32 %v746_v51, 0.0 }
 0x1d7   : > { %v786_v57 = vadd.f32 %v785_v52, %v784_v55  ;;  %v783_v59 = vmul.f32 %v779_v54, %v757_v53 }
 0x1d8   : > { %v782_v58 = vmul.f32 %v775_v41, %v756_v56 }
 0x1d9   : > { %v789_v62 = vsel %vm656_vm1, %v783_v59, 0.0 }
 0x1da   : > { %v787_v60 = vsel %vm656_vm1, %v782_v58, 0.0 }
 0x1db   : > { %v788_v61 = vadd.f32 %v787_v60, %v786_v57 }
 0x1dd   : > { %v790_v63 = vadd.f32 %v789_v62, %v788_v61 }
 0x1df   : > { %v791_v0 = vrot.slane %v790_v63, 4 }
 0x1e1   : > { %v792_v1 = vadd.f32 %v791_v0, %v790_v63 }
 0x1e3   : > { %v793_v2 = vrot.slane %v792_v1, 2 }
 0x1e5   : > { %v794_v3 = vadd.f32 %v793_v2, %v792_v1 }
 0x1e7   : > { %v795_v4 = vrot.slane %v794_v3, 1 }
 0x1e9   : > { %v796_v6 = vadd.f32 %v795_v4, %v794_v3 }
 0x1eb   : > { %v797_v7 = vadd.f32 %v796_v6, %v760_v5 }
 0x1ed   : > { %799 = vst.msk [vmem:[#allocation2] sm:$0x1] %vm525_vm2, %v797_v7 }
 0x1f4   : > { %v803_v8 = vld [vmem:[#allocation2] sm:$0x1] }
 0x1f5   : > { %1306 = vmatmul.mubr.msk.f32.vlgmr.msra.gmra.mrb[4].mxu0 %vm656_vm1, %v803_v8 }
 0x1f6   : > { %1327 = vmatprep.mubr.msk.f32.mxu0 %vm1501_vm3, %v1499_v25  ;;  %1357 = vmatpush3.bf16.msra.mxu0 %v1356_v14 }
 0x1f7   : > { %1358 = vmatprep.subr.bf16.mxu0 %v1500_v29 }
 0x1fa   : > { %1360 = vmatpush3.bf16.msra.mxu0 %v1359_v22 }
 0x2c8   : > { %v878_v16 = vpop.f32.mrb[4].mxu0 }
 0x2c9   : > { %v879_v17 = vadd.f32 %v878_v16, %v808_v15  ;;  %v1307_v18 = vpop.f32.mrb[5].mxu0 }
 0x2cb   : > { %v882_v19 = vmax.f32 %v879_v17, 0.0 }
 0x2cd   : > { %1317 = vmatmul.mubr.msk.f32.vlgmr.msra.gmra.mrb[4].mxu1 %vm656_vm1, %v882_v19 }
 0x2ce   : > { %1332 = vmatprep.mubr.msk.f32.mxu1 %vm1501_vm3, %v1499_v25  ;;  %1331 = vmatpush3.msra.mxu1 %v963_v23  ;;  %v887_v25 = vld [vmem:[%s1814_s10] sm:$0x1] }
 0x2d1   : > { %1333 = vmatmul.mubr.msk.f32.vlgmr.msra.gmra.mrb[6].mxu1 %vm532_vm0, %v962_v24 }
 0x3a0   : > { %v957_v26 = vpop.f32.mrb[4].mxu1 }
 0x3a1   : > { %v958_v27 = vadd.f32 %v957_v26, %v887_v25  ;;  %v1318_v28 = vpop.f32.mrb[5].mxu1 }
 0x3a3   : > { %v961_v29 = vmax.f32 %v958_v27, 0.0 }
 0x3a4   : > { %v1110_v30 = vpop.f32.mrb[6].mxu1 }
 0x3a5   : > { %1328 = vmatmul.mubr.msk.f32.vlgmr.msra.gmra.mrb[6].mxu0 %vm656_vm1, %v961_v29  ;;  %v1334_v31 = vpop.f32.mrb[7].mxu1 }
 0x478   : > { %v1037_v32 = vpop.f32.mrb[6].mxu0 }
 0x479   : > { %v1111_v34 = vadd.f32 %v1110_v30, %v1037_v32  ;;  %v1329_v35 = vpop.f32.mrb[7].mxu0 }
 0x47b   : > { %v1115_v36 = vadd.f32 %v1114_v33, %v1111_v34 }
 0x47d   : > { %1117 = vst.msk [vmem:[%s504_s27] sm:$0x1] %vm1116_vm4, %v1115_v36 }
 0x47e   : > { %1432 = shalt.err (!%p1429_p5)
}
 0x47f   : > { %s1433_s4 = scalar_lea.hbm %s1757_s19, 16  ;;  %s1437_s28 = scalar_lea.hbm %s1818_s14, 32 }
 0x480   : > { %p1434_p6 = scmp.ne.s32.totalorder %s1757_s19, %s1433_s4  ;;  %p1438_p10 = scmp.lt.u32.totalorder %s1757_s19, %s1818_s14 }
 0x481   : > { %p1439_p11 = scmp.lt.u32.totalorder %s1437_s28, %s1433_s4  ;;  %p1441_p13 = scmp.lt.u32.totalorder %s1433_s4, %s1757_s19 }
 0x482   : > { %p1435_p7 = pnand %p1434_p6, %p1618_p4 }
 0x483   : > { %p1440_p12 = por %p1439_p11, %p1438_p10 }
 0x484   : > { %p1436_p9 = pneg %p1435_p7 }
 0x485   : > { %p1442_p0 = por %p1441_p13, %p1440_p12 }
 0x487   : > { %p1443_p1 = pnand %p1442_p0, %p1436_p9 }
 0x489   : > { %1446 = shalt.err (!%p1443_p1)
}
 0x48a   : > { %1361 = dma.vmem_to_hbm [thread:$0]  (%p1618_p4), %s1759_s17, 16, %s1757_s19, %s1119_s20  }
 0x48b PF: > { %p1367_p2 = scmp.ge.s32.totalorder %s1497_s18, 2  ;;  %s1143_s1 = sand.u32 1, %s1477_s29  }
 0x48c   : > { %s1144_s22 = scalar_lea.sflag [#allocation4], %s1143_s1 }
 0x48d   : > { %p1364_p3 = pnand %p1367_p2, %p1625_p8 }
 0x48f   : > { %1472 = dma.done.wait (!%p1364_p3), %s1144_s22, 16  }
 0x490   : > { %1474 = vsyncadd (!%p1364_p3), %s1144_s22, 4294967280  ;;  %s27_s18 = sadd.s32 1, %s1497_s18   ;;  %s1831_s16 = sld [smem:[#allocation6_spill]] }
 0x491   : > { %p24_p5 = scmp.ge.s32.totalorder %s27_s18, 4   ;;  %s1832_s17 = sld [smem:[#allocation7_spill]] }
 0x492   : > { %s1833_s29 = smov %s1481_s30  ;;  %s1834_s30 = smov %s1485_s15 }
 0x493   : > { %s1835_s15 = smov %s1631_s26  ;;  %26 = sbr.rel (!%p24_p5) target bundleno = 8 (0x8), region = 126 }
 0x49a   :  { %1148 = vsyncpa [#allocation4], 1 }
 0x49b   :  { %1150 = vsyncpa [#allocation4 + $0x1], 1 }

</bundles_post_ra>
